<compile_context>
chip_gen: v6e
topology: v6e:2x2x1
jax: 0.10.0
libtpu: 0.0.40
codegen_flags: <defaults>
</compile_context>

<pallas_src>
import numpy as np
import jax
import jax.numpy as jnp
from jax.experimental import pallas as pl
from jax.experimental.pallas import tpu as pltpu


# ----------------------------------------------------------------------------
# Pallas kernel (per pair row): h = a + b; h = SiLU(h@W1+b1); h = SiLU(h@W2+b2)
#                               y = sum(h * w3_row, lanes) + b3
# a/b/W1/W2 are bf16 (MXU native); accumulation & activations are f32.
# ----------------------------------------------------------------------------
def _allpairwise_pair_mlp_kernel(a_ref, b_ref, w1_ref, b1_ref, w2_ref, b2_ref,
                                 w3_ref, b3_ref, o_ref):
    # Symmetric pair sum (each pair computed once; duplicated on the host).
    h0 = a_ref[...] + b_ref[...]                                   # bf16 (tm, C)

    # Linear(C, C) + SiLU  (bf16 MXU inputs, f32 accumulate / f32 activation)
    h = jnp.dot(h0, w1_ref[...], preferred_element_type=jnp.float32)
    h = jax.nn.silu(h + b1_ref[...])

    # Linear(C, C) + SiLU
    h = jnp.dot(h.astype(jnp.bfloat16), w2_ref[...],
                preferred_element_type=jnp.float32)
    h = jax.nn.silu(h + b2_ref[...])

    # Linear(C, 1) as VPU multiply + lane (XLU) reduction: avoids an N=1
    # matmul and yields a lane-dense (1, tile_m) result row.
    y = jnp.sum(h * w3_ref[...], axis=-1) + b3_ref[0]              # (tm,)
    o_ref[...] = y[None, :].astype(o_ref.dtype)                    # (1, tm)


def allpairwise_pair_mlp_pallas(a, b, w1, b1, w2, b2, w3_row, b3, *, tile_m):
    """a, b: [P_padded, C] bf16 pair rows.  Returns f32 [P_padded]."""
    P, C = a.shape
    assert P % tile_m == 0 and tile_m % 128 == 0
    n_tiles = P // tile_m

    full = lambda i: (0, 0)
    in_specs = [
        pl.BlockSpec((tile_m, C), lambda i: (i, 0)),     # first-row features
        pl.BlockSpec((tile_m, C), lambda i: (i, 0)),     # second-row features
        pl.BlockSpec((C, C), full),                      # W1 (bf16)
        pl.BlockSpec((1, C), full),                      # b1 (f32)
        pl.BlockSpec((C, C), full),                      # W2 (bf16)
        pl.BlockSpec((1, C), full),                      # b2 (f32)
        pl.BlockSpec((1, C), full),                      # W3 as a row (f32)
        pl.BlockSpec(memory_space=pltpu.MemorySpace.SMEM),  # b3 scalar
    ]
    # Lane-dense output: (1, P) array, (1, tile_m) blocks -> unmasked stores.
    out_spec = pl.BlockSpec((1, tile_m), lambda i: (0, i))

    y = pl.pallas_call(
        _allpairwise_pair_mlp_kernel,
        out_shape=jax.ShapeDtypeStruct((1, P), jnp.float32),
        grid_spec=pltpu.PrefetchScalarGridSpec(
            num_scalar_prefetch=0,
            grid=(n_tiles,),
            in_specs=in_specs,
            out_specs=out_spec,
        ),
        compiler_params=pltpu.CompilerParams(
            dimension_semantics=("parallel",)),
    )(a, b, w1, b1, w2, b2, w3_row, b3)
    return y.reshape(P)


# ----------------------------------------------------------------------------
# Host-side glue: mirrors the PyTorch index construction exactly.
# ----------------------------------------------------------------------------
def build_pair_indices(is_cleave_np, batch_np):
    cleave_idx = np.nonzero(is_cleave_np)[0]                  # x[is_cleave]
    cleave_batch = batch_np[cleave_idx]                       # batch[is_cleave]
    num_graphs = int(batch_np.max()) + 1
    counts = np.bincount(cleave_batch, minlength=num_graphs)  # scatter_add(ones)
    assert np.all(counts % 2 == 0), "each graph needs an even cleave count"
    num_per_graph = counts // 2
    accumulated = np.zeros(num_graphs + 1, dtype=np.int64)
    accumulated[1:] = np.cumsum(num_per_graph)
    total_pairs = int(num_per_graph.sum())
    first_row = (np.arange(total_pairs)
                 + np.repeat(accumulated[:-1], num_per_graph)).astype(np.int64)
    second_row = (first_row
                  + np.repeat(num_per_graph, num_per_graph)).astype(np.int64)
    return cleave_idx.astype(np.int64), first_row, second_row


def _round_up(x, m):
    return ((x + m - 1) // m) * m


def _choose_tile(num_pairs, tile_m_max):
    # Multiple of 128 (lane-dense output, bf16 sublane packing), don't
    # over-pad tiny inputs, and keep >=2 grid steps for v7x's 2 TensorCores
    # when the problem is large enough.
    tm = min(tile_m_max, _round_up(num_pairs, 128))
    if num_pairs > 2 * 128:
        tm = min(tm, _round_up(-(-num_pairs // 2), 128))
    return max(tm, 128)


def allpairwise_forward(x, is_cleave_np, batch_np, params, *, tile_m=512):
    w1, b1, w2, b2, w3, b3 = params
    cleave_idx, first_row, second_row = build_pair_indices(is_cleave_np, batch_np)
    M = cleave_idx.shape[0]
    P = first_row.shape[0]

    # Gather pair rows directly from x (no partner re-gather of an
    # intermediate HBM array) and stream them to the kernel as bf16.
    x_bf16 = x.astype(jnp.bfloat16)
    a = x_bf16[jnp.asarray(cleave_idx[first_row])]            # [P, C]
    b = x_bf16[jnp.asarray(cleave_idx[second_row])]           # [P, C]

    tm = _choose_tile(P, tile_m)
    P_pad = _round_up(P, tm)
    if P_pad != P:
        pad = ((0, P_pad - P), (0, 0))
        a = jnp.pad(a, pad)
        b = jnp.pad(b, pad)

    y_pairs = allpairwise_pair_mlp_pallas(
        a, b,
        w1.astype(jnp.bfloat16), b1,
        w2.astype(jnp.bfloat16), b2,
        w3.reshape(1, -1).astype(jnp.float32),   # (1, C) row for lane-reduce
        b3.reshape(-1).astype(jnp.float32),      # (1,) scalar in SMEM
        tile_m=tm)[:P]

    # out[first_row] == out[second_row] == MLP(pair sum): duplicate the scalar.
    # TODO(synk): num_target > 1 would need a small (C, num_target) dot instead
    # of the lane-reduce projection; the module default (num_target=1) is what
    # is implemented here.
    out = jnp.zeros((M,), jnp.float32)
    out = out.at[jnp.asarray(first_row)].set(y_pairs)
    out = out.at[jnp.asarray(second_row)].set(y_pairs)
    return out                                                 # == out.view(-1)


# ----------------------------------------------------------------------------
# Parameter init (deterministic stand-in for Glorot_Ortho_) and references.
# ----------------------------------------------------------------------------
def glorot_ortho(key, fan_in, fan_out):
    n = max(fan_in, fan_out)
    q, r = jnp.linalg.qr(jax.random.normal(key, (n, n), dtype=jnp.float32))
    q = q * jnp.sign(jnp.diagonal(r))[None, :]
    gain = jnp.sqrt(2.0 / (fan_in + fan_out))
    return (q[:fan_in, :fan_out] * gain).astype(jnp.float32)


def _reference_f32(x, is_cleave_np, batch_np, params):
    """Pure-f32 JAX mirror of the PyTorch forward (semantic reference)."""
    w1, b1, w2, b2, w3, b3 = params
    cleave_idx, first_row, second_row = build_pair_indices(is_cleave_np, batch_np)
    out = x[jnp.asarray(cleave_idx)]
    s = out[jnp.asarray(first_row)] + out[jnp.asarray(second_row)]
    out = out.at[jnp.asarray(first_row)].set(s).at[jnp.asarray(second_row)].set(s)
    h = jax.nn.silu(out @ w1 + b1)
    h = jax.nn.silu(h @ w2 + b2)
    return (h @ w3 + b3).reshape(-1)


def _reference_bf16(x, is_cleave_np, batch_np, params):
    """Same bf16-input / f32-accumulate math as the kernel (numeric reference)."""
    w1, b1, w2, b2, w3, b3 = params
    cleave_idx, first_row, second_row = build_pair_indices(is_cleave_np, batch_np)
    xb = x.astype(jnp.bfloat16)
    a = xb[jnp.asarray(cleave_idx[first_row])]
    b = xb[jnp.asarray(cleave_idx[second_row])]
    h0 = a + b
    h = jax.nn.silu(jnp.dot(h0, w1.astype(jnp.bfloat16),
                            preferred_element_type=jnp.float32) + b1)
    h = jax.nn.silu(jnp.dot(h.astype(jnp.bfloat16), w2.astype(jnp.bfloat16),
                            preferred_element_type=jnp.float32) + b2)
    y = jnp.sum(h * w3.reshape(1, -1), axis=-1) + b3.reshape(-1)[0]
    M = cleave_idx.shape[0]
    out = jnp.zeros((M,), jnp.float32)
    return out.at[jnp.asarray(first_row)].set(y).at[jnp.asarray(second_row)].set(y)


# ----------------------------------------------------------------------------
if __name__ == "__main__":
    # N = 24 nodes, 2 graphs (12 nodes each), C = 128 channels,
    # 8 cleave nodes per graph -> M = 16 selected rows, P = 8 pairs.
    N, C, num_target = 24, 128, 1
    key = jax.random.PRNGKey(0)
    kx, k1, k2, k3 = jax.random.split(key, 4)

    x = jax.random.normal(kx, (N, C), dtype=jnp.float32)
    batch_np = np.repeat(np.array([0, 1]), 12)
    is_cleave_np = np.zeros(N, dtype=bool)
    is_cleave_np[[0, 1, 2, 3, 5, 7, 9, 11]] = True          # graph 0
    is_cleave_np[[12, 13, 14, 16, 18, 20, 22, 23]] = True   # graph 1

    # MLP (mlp_depth=3): Linear(C,C), SiLU, Linear(C,C), SiLU, Linear(C,1)
    w1 = glorot_ortho(k1, C, C)
    b1 = jnp.zeros((1, C), dtype=jnp.float32)
    w2 = glorot_ortho(k2, C, C)
    b2 = jnp.zeros((1, C), dtype=jnp.float32)
    w3 = glorot_ortho(k3, C, num_target)
    b3 = jnp.zeros((1, num_target), dtype=jnp.float32)
    params = (w1, b1, w2, b2, w3, b3)

    y = jax.block_until_ready(allpairwise_forward(x, is_cleave_np, batch_np, params))
    y_bf16 = jax.block_until_ready(_reference_bf16(x, is_cleave_np, batch_np, params))
    y_f32 = jax.block_until_ready(_reference_f32(x, is_cleave_np, batch_np, params))

    M = int(is_cleave_np.sum())
    assert y.shape == (M * num_target,)
    # Kernel matches the bf16-input reference tightly ...
    assert np.allclose(np.asarray(y), np.asarray(y_bf16), rtol=5e-3, atol=5e-3)
    # ... and the f32 module semantics up to bf16 quantization.
    assert np.allclose(np.asarray(y), np.asarray(y_f32), rtol=5e-2, atol=5e-2)

    print("KERNEL_OK")
</pallas_src>

<mosaic_0001>
module attributes {stable_mosaic.version = 11 : i64} {
  func.func @_allpairwise_pair_mlp_kernel(%arg0: i32, %arg1: memref<128x128xbf16, #tpu.memory_space<vmem>>, %arg2: memref<128x128xbf16, #tpu.memory_space<vmem>>, %arg3: memref<128x128xbf16, #tpu.memory_space<vmem>>, %arg4: memref<1x128xf32, #tpu.memory_space<vmem>>, %arg5: memref<128x128xbf16, #tpu.memory_space<vmem>>, %arg6: memref<1x128xf32, #tpu.memory_space<vmem>>, %arg7: memref<1x128xf32, #tpu.memory_space<vmem>>, %arg8: memref<1xf32, #tpu.memory_space<smem>>, %arg9: memref<1x128xf32, #tpu.memory_space<vmem>>) attributes {dimension_semantics = [#tpu.dimension_semantics<parallel>], iteration_bounds = array<i64: 1>, scalar_prefetch = 0 : i64, scratch_operands = 0 : i64, tpu.core_type = #tpu.core_type<tc>, window_params = [{transform_indices = @transform_0, window_bounds = array<i64: 128, 128>}, {transform_indices = @transform_1, window_bounds = array<i64: 128, 128>}, {pipeline_mode = #tpu.pipeline_mode<synchronous>, transform_indices = @transform_2, window_bounds = array<i64: 128, 128>}, {pipeline_mode = #tpu.pipeline_mode<synchronous>, transform_indices = @transform_3, window_bounds = array<i64: 1, 128>}, {pipeline_mode = #tpu.pipeline_mode<synchronous>, transform_indices = @transform_4, window_bounds = array<i64: 128, 128>}, {pipeline_mode = #tpu.pipeline_mode<synchronous>, transform_indices = @transform_5, window_bounds = array<i64: 1, 128>}, {pipeline_mode = #tpu.pipeline_mode<synchronous>, transform_indices = @transform_6, window_bounds = array<i64: 1, 128>}, {transform_indices = @transform_7, window_bounds = array<i64: 1>}, {transform_indices = @transform_8, window_bounds = array<i64: 1, 128>}]} {
    %c0 = arith.constant 0 : index
    %c0_0 = arith.constant 0 : index
    %0 = vector.load %arg1[%c0, %c0_0] : memref<128x128xbf16, #tpu.memory_space<vmem>>, vector<128x128xbf16>
    %c0_1 = arith.constant 0 : index
    %c0_2 = arith.constant 0 : index
    %1 = vector.load %arg2[%c0_1, %c0_2] : memref<128x128xbf16, #tpu.memory_space<vmem>>, vector<128x128xbf16>
    %2 = arith.addf %0, %1 : vector<128x128xbf16>
    %c0_3 = arith.constant 0 : index
    %c0_4 = arith.constant 0 : index
    %3 = vector.load %arg3[%c0_3, %c0_4] : memref<128x128xbf16, #tpu.memory_space<vmem>>, vector<128x128xbf16>
    %cst = arith.constant dense<0.000000e+00> : vector<128x128xf32>
    %4 = tpu.matmul %2, %3, %cst {dimension_numbers = #tpu.dot_dimension_numbers<[1], [0], [0], [1], [0, 0, 1, 1], [], []>} : vector<128x128xbf16>, vector<128x128xbf16>, vector<128x128xf32> -> vector<128x128xf32>
    %c0_5 = arith.constant 0 : index
    %c0_6 = arith.constant 0 : index
    %5 = vector.load %arg4[%c0_5, %c0_6] : memref<1x128xf32, #tpu.memory_space<vmem>>, vector<1x128xf32>
    %6 = vector.broadcast %5 : vector<1x128xf32> to vector<128x128xf32>
    %7 = arith.addf %4, %6 : vector<128x128xf32>
    %8 = arith.negf %7 : vector<128x128xf32>
    %9 = math.exp %8 : vector<128x128xf32>
    %cst_7 = arith.constant 1.000000e+00 : f32
    %10 = vector.broadcast %cst_7 : f32 to vector<128x128xf32>
    %11 = arith.addf %10, %9 : vector<128x128xf32>
    %12 = arith.divf %10, %11 : vector<128x128xf32>
    %13 = arith.mulf %7, %12 : vector<128x128xf32>
    %14 = arith.truncf %13 : vector<128x128xf32> to vector<128x128xbf16>
    %c0_8 = arith.constant 0 : index
    %c0_9 = arith.constant 0 : index
    %15 = vector.load %arg5[%c0_8, %c0_9] : memref<128x128xbf16, #tpu.memory_space<vmem>>, vector<128x128xbf16>
    %cst_10 = arith.constant dense<0.000000e+00> : vector<128x128xf32>
    %16 = tpu.matmul %14, %15, %cst_10 {dimension_numbers = #tpu.dot_dimension_numbers<[1], [0], [0], [1], [0, 0, 1, 1], [], []>} : vector<128x128xbf16>, vector<128x128xbf16>, vector<128x128xf32> -> vector<128x128xf32>
    %c0_11 = arith.constant 0 : index
    %c0_12 = arith.constant 0 : index
    %17 = vector.load %arg6[%c0_11, %c0_12] : memref<1x128xf32, #tpu.memory_space<vmem>>, vector<1x128xf32>
    %18 = vector.broadcast %17 : vector<1x128xf32> to vector<128x128xf32>
    %19 = arith.addf %16, %18 : vector<128x128xf32>
    %20 = arith.negf %19 : vector<128x128xf32>
    %21 = math.exp %20 : vector<128x128xf32>
    %cst_13 = arith.constant 1.000000e+00 : f32
    %22 = vector.broadcast %cst_13 : f32 to vector<128x128xf32>
    %23 = arith.addf %22, %21 : vector<128x128xf32>
    %24 = arith.divf %22, %23 : vector<128x128xf32>
    %25 = arith.mulf %19, %24 : vector<128x128xf32>
    %c0_14 = arith.constant 0 : index
    %c0_15 = arith.constant 0 : index
    %26 = vector.load %arg7[%c0_14, %c0_15] : memref<1x128xf32, #tpu.memory_space<vmem>>, vector<1x128xf32>
    %27 = vector.broadcast %26 : vector<1x128xf32> to vector<128x128xf32>
    %28 = arith.mulf %25, %27 : vector<128x128xf32>
    %cst_16 = arith.constant dense<0.000000e+00> : vector<128xf32>
    %29 = vector.multi_reduction <add>, %28, %cst_16 [1] : vector<128x128xf32> to vector<128xf32>
    %c0_17 = arith.constant 0 : index
    %30 = memref.load %arg8[%c0_17] : memref<1xf32, #tpu.memory_space<smem>>
    %31 = vector.broadcast %30 : f32 to vector<128xf32>
    %32 = arith.addf %29, %31 : vector<128xf32>
    %33 = vector.shape_cast %32 : vector<128xf32> to vector<1x128xf32>
    %c0_18 = arith.constant 0 : index
    %c0_19 = arith.constant 0 : index
    %34 = vector.load %arg9[%c0_18, %c0_19] : memref<1x128xf32, #tpu.memory_space<vmem>>, vector<1x128xf32>
    tpu.vector_store %arg9[%c0_18, %c0_19], %33 {strides = array<i32>} : memref<1x128xf32, #tpu.memory_space<vmem>>, vector<1x128xf32>,
    return
  }
  func.func @transform_0(%arg0: i32) -> (i32, i32) {
    %c0_i32 = arith.constant 0 : i32
    %c0_i32_0 = arith.constant 0 : i32
    return %arg0, %c0_i32 : i32, i32
  }
  func.func @transform_1(%arg0: i32) -> (i32, i32) {
    %c0_i32 = arith.constant 0 : i32
    %c0_i32_0 = arith.constant 0 : i32
    return %arg0, %c0_i32 : i32, i32
  }
  func.func @transform_2(%arg0: i32) -> (i32, i32) {
    %c0_i32 = arith.constant 0 : i32
    %c0_i32_0 = arith.constant 0 : i32
    %c0_i32_1 = arith.constant 0 : i32
    return %c0_i32, %c0_i32_0 : i32, i32
  }
  func.func @transform_3(%arg0: i32) -> (i32, i32) {
    %c0_i32 = arith.constant 0 : i32
    %c0_i32_0 = arith.constant 0 : i32
    %c0_i32_1 = arith.constant 0 : i32
    return %c0_i32, %c0_i32_0 : i32, i32
  }
  func.func @transform_4(%arg0: i32) -> (i32, i32) {
    %c0_i32 = arith.constant 0 : i32
    %c0_i32_0 = arith.constant 0 : i32
    %c0_i32_1 = arith.constant 0 : i32
    return %c0_i32, %c0_i32_0 : i32, i32
  }
  func.func @transform_5(%arg0: i32) -> (i32, i32) {
    %c0_i32 = arith.constant 0 : i32
    %c0_i32_0 = arith.constant 0 : i32
    %c0_i32_1 = arith.constant 0 : i32
    return %c0_i32, %c0_i32_0 : i32, i32
  }
  func.func @transform_6(%arg0: i32) -> (i32, i32) {
    %c0_i32 = arith.constant 0 : i32
    %c0_i32_0 = arith.constant 0 : i32
    %c0_i32_1 = arith.constant 0 : i32
    return %c0_i32, %c0_i32_0 : i32, i32
  }
  func.func @transform_7(%arg0: i32) -> i32 {
    %c0_i32 = arith.constant 0 : i32
    %c0_i32_0 = arith.constant 0 : i32
    return %c0_i32 : i32
  }
  func.func @transform_8(%arg0: i32) -> (i32, i32) {
    %c0_i32 = arith.constant 0 : i32
    %c0_i32_0 = arith.constant 0 : i32
    return %c0_i32, %arg0 : i32, i32
  }
}

</mosaic_0001>

<bundles_post_ra>
// kernel: tpu_custom_call.1
= control target key start
LH: loop header
LB: loop body
LE: loop exit
PB: predicated region body
PF: predicated region fallthrough
CT: control target
= control target key end

     0   :  { %14 = vsyncpa [#allocation4], 0  ;;  %s1711_s0 = inlined_call_operand.hbm [shape: bf16[128,128], index: 0, kind: input, shape index: {}]   ;;  %s1712_s1 = inlined_call_operand.hbm [shape: bf16[128,128], index: 1, kind: input, shape index: {}]   ;;  %s1713_s2 = inlined_call_operand.hbm [shape: bf16[128,128], index: 2, kind: input, shape index: {}]   ;;  %s1714_s3 = inlined_call_operand.vmem [shape: f32[1,128], index: 3, kind: input, shape index: {}]   ;;  %s1715_s4 = inlined_call_operand.hbm [shape: bf16[128,128], index: 4, kind: input, shape index: {}]   ;;  %s1716_s5 = inlined_call_operand.vmem [shape: f32[1,128], index: 5, kind: input, shape index: {}]   ;;  %s1717_s6 = inlined_call_operand.vmem [shape: f32[1,128], index: 6, kind: input, shape index: {}]   ;;  %s1718_s7 = inlined_call_operand.<no memory space> [shape: f32[1], index: 7, kind: input, shape index: {}]   ;;  %s1719_s8 = inlined_call_operand.hbm [shape: f32[1,128], index: 8, kind: output, shape index: {}]  }
   0x1   :  { %15 = vsyncpa [#allocation7], 0 }
   0x2   :  { %16 = vsyncpa [#allocation10], 0 }
   0x3   :  { %17 = vsyncpa [#allocation5], 0  ;;  %s1384_s27 = smov [#allocation6]   ;;  %s1385_s29 = smov [#allocation3]  }
   0x4   :  { %s35_s28 = sshll.u32 %s1384_s27, 4  ;;  %s23_s30 = sshll.u32 %s1385_s29, 4  ;;  %s36_s28 = int_to_ptr.vmem [resolvable:$true] %s35_s28  ;;  %s24_s30 = int_to_ptr.vmem [resolvable:$true] %s23_s30 }
   0x5   :  { %s1284_s9 = scalar_lea.vmem %s36_s28, 1024  ;;  %p1289_p1 = scmp.lt.s32.totalorder %s36_s28, %s36_s28 }
   0x6   :  { %p1285_p0 = scmp.ne.s32.totalorder %s36_s28, %s1284_s9  ;;  %p1290_p2 = scmp.lt.s32.totalorder %s1284_s9, %s1284_s9 }
   0x8   :  { %p1291_p3 = por %p1290_p2, %p1289_p1 }
   0xa   :  { %p1292_p4 = pnand %p1291_p3, %p1285_p0 }
   0xc   :  { %1295 = shalt.err (!%p1292_p4)
}
   0xd   :  { %s1386_s10 = smov 64   ;;  %s1387_s11 = smov 4  }
   0xe   :  { %41 = dma.hbm_to_vmem [thread:$0]  %s1712_s1, 1024, %s36_s28, [#allocation7], %s1386_s10, %s1386_s10, %s1387_s11  }
   0xf   :  { %s1304_s14 = scalar_lea.vmem %s24_s30, 1024  ;;  %p1309_p6 = scmp.lt.s32.totalorder %s24_s30, %s24_s30 }
  0x10   :  { %p1305_p5 = scmp.ne.s32.totalorder %s24_s30, %s1304_s14  ;;  %p1310_p7 = scmp.lt.s32.totalorder %s1304_s14, %s1304_s14 }
  0x12   :  { %p1311_p8 = por %p1310_p7, %p1309_p6 }
  0x14   :  { %p1312_p9 = pnand %p1311_p8, %p1305_p5 }
  0x16   :  { %1315 = shalt.err (!%p1312_p9)
}
  0x17   :  { %29 = dma.hbm_to_vmem [thread:$0]  %s1711_s0, 1024, %s24_s30, [#allocation4], %s1386_s10, %s1386_s10, %s1387_s11  }
  0x18   :  { %s1388_s17 = smov [#allocation8]   ;;  %s1389_s19 = smov [#allocation9]  }
  0x19   :  { %s47_s18 = sshll.u32 %s1388_s17, 4  ;;  %s61_s20 = sshll.u32 %s1389_s19, 4  ;;  %s48_s18 = int_to_ptr.vmem [resolvable:$true] %s47_s18  ;;  %s62_s20 = int_to_ptr.vmem [resolvable:$true] %s61_s20 }
  0x1a   :  { %s1324_s1 = scalar_lea.vmem %s48_s18, 1024  ;;  %p1329_p11 = scmp.lt.s32.totalorder %s48_s18, %s48_s18 }
  0x1b   :  { %p1325_p10 = scmp.ne.s32.totalorder %s48_s18, %s1324_s1  ;;  %p1330_p12 = scmp.lt.s32.totalorder %s1324_s1, %s1324_s1 }
  0x1d   :  { %p1331_p13 = por %p1330_p12, %p1329_p11 }
  0x1f   :  { %p1332_p0 = pnand %p1331_p13, %p1325_p10 }
  0x21   :  { %1335 = shalt.err (!%p1332_p0)
}
  0x22   :  { %53 = dma.hbm_to_vmem [thread:$0]  %s1713_s2, 1024, %s48_s18, [#allocation7], %s1386_s10, %s1386_s10, %s1387_s11  }
  0x23   :  { %s1344_s0 = scalar_lea.vmem %s62_s20, 1024  ;;  %p1349_p2 = scmp.lt.s32.totalorder %s62_s20, %s62_s20 }
  0x24   :  { %p1345_p1 = scmp.ne.s32.totalorder %s62_s20, %s1344_s0  ;;  %p1350_p3 = scmp.lt.s32.totalorder %s1344_s0, %s1344_s0 }
  0x26   :  { %p1351_p4 = por %p1350_p3, %p1349_p2 }
  0x28   :  { %p1352_p5 = pnand %p1351_p4, %p1345_p1 }
  0x2a   :  { %1355 = shalt.err (!%p1352_p5)
}
  0x2b   :  { %67 = dma.hbm_to_vmem [thread:$0]  %s1715_s4, 1024, %s62_s20, [#allocation10], %s1386_s10, %s1386_s10, %s1387_s11  }
  0x2c   :  { %1376 = dma.done.wait [#allocation4], 1024  }
  0x2d   :  { %1377 = vsyncadd [#allocation4], 4294966272 }
  0x2e   :  { %1378 = dma.done.wait [#allocation7], 2048  }
  0x2f   :  { %1379 = vsyncadd [#allocation7], 4294965248 }
  0x30   :  { %1380 = dma.done.wait [#allocation10], 1024  }
  0x31   :  { %1381 = vsyncadd [#allocation10], 4294966272  ;;  %v1132_v0 = vld [vmem:[#allocation8 + $0x38] sm:$0xff]   ;;  %v1133_v1 = vld [vmem:[#allocation8 + $0x30] sm:$0xff]   ;;  %vm851_vm0 = vcmask 130112   ;;  %vm858_vm1 = vcmask 195712  }
  0x32   :  { %1061 = vmatprep.subr.bf16.mxu0 %v1132_v0  ;;  %v1134_v2 = vld [vmem:[#allocation8 + $0x28] sm:$0xff]   ;;  %v1135_v3 = vld [vmem:[#allocation8 + $0x20] sm:$0xff]   ;;  %v1136_v10 = vld [vmem:[#allocation8 + $0x18] sm:$0xff]   ;;  %vm865_vm2 = vcmask 261312   ;;  %vm872_vm3 = vcmask 326912   ;;  %vm879_vm4 = vcmask 392512  }
  0x33   :  { %1062 = vmatpush3.bf16.msra.mxu0 %v1132_v0  ;;  %v87_v4 = vld [vmem:[#allocation3] sm:$0xf]  ;;  %v88_v5 = vld [vmem:[#allocation3 + $0x4] sm:$0xf]  ;;  %v1137_v12 = vld [vmem:[#allocation8 + $0x10] sm:$0xff]   ;;  %vm886_vm5 = vcmask 458112  }
  0x34   :  { %1063 = vmatprep.subr.bf16.mxu0 %v1133_v1  ;;  %v103_v6 = vld [vmem:[#allocation6] sm:$0xf]  ;;  %v104_v7 = vld [vmem:[#allocation6 + $0x4] sm:$0xf]  ;;  %v1138_v13 = vld [vmem:[#allocation8 + $0x8] sm:$0xff]   ;;  %vm893_vm6 = vcmask 523712  }
  0x35   :  { %v119_v8 = vadd.bf16 %v103_v6, %v87_v4  ;;  %v120_v9 = vadd.bf16 %v104_v7, %v88_v5  ;;  %v89_v14 = vld [vmem:[#allocation3 + $0x8] sm:$0xf]  ;;  %v90_v15 = vld [vmem:[#allocation3 + $0xc] sm:$0xf]  ;;  %v1139_v18 = vld [vmem:[#allocation8] sm:$0xff]   ;;  %vm900_vm7 = vcmask 589312  }
  0x36   :  { %v105_v16 = vld [vmem:[#allocation6 + $0x8] sm:$0xf]  ;;  %v106_v17 = vld [vmem:[#allocation6 + $0xc] sm:$0xf]  ;;  %v91_v19 = vld [vmem:[#allocation3 + $0x10] sm:$0xf] }
  0x37   :  { %1064 = vmatpush3.bf16.msra.mxu0 %v1133_v1  ;;  %v971_v11 = vcombine.low %v119_v8, %v120_v9  ;;  %v92_v20 = vld [vmem:[#allocation3 + $0x14] sm:$0xf]  ;;  %v107_v21 = vld [vmem:[#allocation6 + $0x10] sm:$0xf]  ;;  %v121_v23 = vadd.bf16 %v105_v16, %v89_v14  ;;  %v122_v24 = vadd.bf16 %v106_v17, %v90_v15  ;;  %v93_v28 = vld [vmem:[#allocation3 + $0x18] sm:$0xf] }
  0x38   :  { %1065 = vmatprep.subr.bf16.mxu0 %v1134_v2  ;;  %v108_v22 = vld [vmem:[#allocation6 + $0x14] sm:$0xf]  ;;  %v123_v25 = vadd.bf16 %v107_v21, %v91_v19  ;;  %v94_v29 = vld [vmem:[#allocation3 + $0x1c] sm:$0xf]  ;;  %v109_v31 = vld [vmem:[#allocation6 + $0x18] sm:$0xf] }
  0x39   :  { %1077 = vmatprep.mubr.bf16.mxu0 %v971_v11  ;;  %v124_v26 = vadd.bf16 %v108_v22, %v92_v20  ;;  %v972_v27 = vcombine.low %v121_v23, %v122_v24  ;;  %v110_v32 = vld [vmem:[#allocation6 + $0x1c] sm:$0xf]  ;;  %v95_v33 = vld [vmem:[#allocation3 + $0x20] sm:$0xf]  ;;  %v96_v34 = vld [vmem:[#allocation3 + $0x24] sm:$0xf]  ;;  %v125_v37 = vadd.bf16 %v109_v31, %v93_v28 }
  0x3a   :  { %v111_v35 = vld [vmem:[#allocation6 + $0x20] sm:$0xf]  ;;  %v112_v36 = vld [vmem:[#allocation6 + $0x24] sm:$0xf]  ;;  %v126_v38 = vadd.bf16 %v110_v32, %v94_v29  ;;  %v97_v42 = vld [vmem:[#allocation3 + $0x28] sm:$0xf] }
  0x3b   :  { %1066 = vmatpush3.bf16.msra.mxu0 %v1134_v2  ;;  %v973_v30 = vcombine.low %v123_v25, %v124_v26  ;;  %v127_v39 = vadd.bf16 %v111_v35, %v95_v33  ;;  %v128_v40 = vadd.bf16 %v112_v36, %v96_v34  ;;  %v98_v43 = vld [vmem:[#allocation3 + $0x2c] sm:$0xf]  ;;  %v113_v45 = vld [vmem:[#allocation6 + $0x28] sm:$0xf]  ;;  %v99_v47 = vld [vmem:[#allocation3 + $0x30] sm:$0xf] }
  0x3c   :  { %1067 = vmatprep.subr.bf16.mxu0 %v1135_v3  ;;  %v974_v41 = vcombine.low %v125_v37, %v126_v38  ;;  %v114_v46 = vld [vmem:[#allocation6 + $0x2c] sm:$0xf]  ;;  %v100_v48 = vld [vmem:[#allocation3 + $0x34] sm:$0xf]  ;;  %v115_v49 = vld [vmem:[#allocation6 + $0x30] sm:$0xf]  ;;  %v129_v51 = vadd.bf16 %v113_v45, %v97_v42 }
  0x3d   :  { %v975_v44 = vcombine.low %v127_v39, %v128_v40  ;;  %v116_v50 = vld [vmem:[#allocation6 + $0x34] sm:$0xf]  ;;  %v130_v52 = vadd.bf16 %v114_v46, %v98_v43  ;;  %v131_v53 = vadd.bf16 %v115_v49, %v99_v47  ;;  %v101_v56 = vld [vmem:[#allocation3 + $0x38] sm:$0xf]  ;;  %v102_v58 = vld [vmem:[#allocation3 + $0x3c] sm:$0xf] }
  0x3e   :  { %v132_v54 = vadd.bf16 %v116_v50, %v100_v48  ;;  %v117_v59 = vld [vmem:[#allocation6 + $0x38] sm:$0xf]  ;;  %v118_v60 = vld [vmem:[#allocation6 + $0x3c] sm:$0xf]  ;;  %v1141_v1 = vld [vmem:[#allocation9 + $0x30] sm:$0xff]   ;;  %vm907_vm8 = vcmask 654912  }
  0x3f   :  { %1068 = vmatpush3.bf16.msra.mxu0 %v1135_v3  ;;  %v976_v55 = vcombine.low %v129_v51, %v130_v52  ;;  %v133_v61 = vadd.bf16 %v117_v59, %v101_v56  ;;  %v134_v62 = vadd.bf16 %v118_v60, %v102_v58  ;;  %v1140_v0 = vld [vmem:[#allocation9 + $0x38] sm:$0xff]   ;;  %v1142_v2 = vld [vmem:[#allocation9 + $0x28] sm:$0xff]   ;;  %v1143_v3 = vld [vmem:[#allocation9 + $0x20] sm:$0xff]   ;;  %vm914_vm9 = vcmask 720512  }
  0x40   :  { %1069 = vmatprep.subr.bf16.mxu0 %v1136_v10  ;;  %v977_v57 = vcombine.low %v131_v53, %v132_v54  ;;  %1093 = vmatprep.subr.bf16.mxu1 %v1140_v0  ;;  %v1144_v4 = vld [vmem:[#allocation9 + $0x18] sm:$0xff]   ;;  %v1145_v5 = vld [vmem:[#allocation9 + $0x10] sm:$0xff]   ;;  %v1146_v6 = vld [vmem:[#allocation9 + $0x8] sm:$0xff]   ;;  %vm921_vm10 = vcmask 786112   ;;  %vm928_vm11 = vcmask 851712   ;;  %vm935_vm12 = vcmask 917312  }
  0x41   :  { %v978_v63 = vcombine.low %v133_v61, %v134_v62  ;;  %1094 = vmatpush3.bf16.msra.mxu1 %v1140_v0  ;;  %v1147_v7 = vld [vmem:[#allocation9] sm:$0xff]   ;;  %vm942_vm13 = vcmask 982912   ;;  %vm949_vm14 = vcmask 1048512  }
  0x42   :  { %1095 = vmatprep.subr.bf16.mxu1 %v1141_v1  ;;  %v1463_v8 = vld [vmem:[%s1714_s3] ss:$0 sm:$0xff] }
  0x43   :  { %1070 = vmatpush3.bf16.msra.mxu0 %v1136_v10 }
  0x44   :  { %1071 = vmatprep.subr.bf16.mxu0 %v1137_v12 }
  0x45   :  { %1096 = vmatpush3.bf16.msra.mxu1 %v1141_v1 }
  0x46   :  { %1097 = vmatprep.subr.bf16.mxu1 %v1142_v2 }
  0x47   :  { %1072 = vmatpush3.bf16.msra.mxu0 %v1137_v12 }
  0x48   :  { %1073 = vmatprep.subr.bf16.mxu0 %v1138_v13 }
  0x49   :  { %1098 = vmatpush3.bf16.msra.mxu1 %v1142_v2 }
  0x4a   :  { %1099 = vmatprep.subr.bf16.mxu1 %v1143_v3 }
  0x4b   :  { %1074 = vmatpush3.bf16.msra.mxu0 %v1138_v13 }
  0x4c   :  { %1075 = vmatprep.subr.bf16.mxu0 %v1139_v18 }
  0x4d   :  { %1100 = vmatpush3.bf16.msra.mxu1 %v1143_v3 }
  0x4e   :  { %1101 = vmatprep.subr.bf16.mxu1 %v1144_v4 }
  0x4f   :  { %1076 = vmatpush3.bf16.msra.mxu0 %v1139_v18 }
  0x51   :  { %1102 = vmatpush3.bf16.msra.mxu1 %v1144_v4 }
  0x52   :  { %1078 = vmatmul.mubr.bf16.vlgmr.msra.gmra.mxu0 %v972_v27  ;;  %1103 = vmatprep.subr.bf16.mxu1 %v1145_v5 }
  0x53   :  { %1081 = vmatprep.mubr.bf16.mxu0 %v973_v30 }
  0x55   :  { %1104 = vmatpush3.bf16.msra.mxu1 %v1145_v5 }
  0x56   :  { %1105 = vmatprep.subr.bf16.mxu1 %v1146_v6 }
  0x59   :  { %1106 = vmatpush3.bf16.msra.mxu1 %v1146_v6 }
  0x5a   :  { %1082 = vmatmul.mubr.bf16.gmra.mxu0 %v974_v41  ;;  %1107 = vmatprep.subr.bf16.mxu1 %v1147_v7 }
  0x5b   :  { %1085 = vmatprep.mubr.bf16.mxu0 %v975_v44 }
  0x5d   :  { %1108 = vmatpush3.bf16.msra.mxu1 %v1147_v7 }
  0x62   :  { %1086 = vmatmul.mubr.bf16.gmra.mxu0 %v976_v55 }
  0x63   :  { %1089 = vmatprep.mubr.bf16.mxu0 %v977_v57 }
  0x6a   :  { %1090 = vmatmul.mubr.bf16.gmra.mxu0 %v978_v63 }
 0x112   :  { %v1079_v9 = vpop.f32.mrf.mxu0 }
 0x113   :  { %v1466_v10 = vadd.f32 %v1079_v9, %v1463_v8 }
 0x114   :  { %v288_v11 = vpop.f32.mrf.mxu0 }
 0x115   :  { %v989_v12 = vmul.f32 -1.442695, %v1466_v10  ;;  %v1470_v13 = vadd.f32 %v1463_v8, %v288_v11 }
 0x116   :  { %v1080_v14 = vpop.f32.mrf.mxu0 }
 0x117   :  { %1148 = vpow2.f32 %v989_v12  ;;  %v987_v15 = vmul.f32 -1.442695, %v1470_v13  ;;  %v1474_v16 = vadd.f32 %v1080_v14, %v1463_v8 }
 0x118   :  { %v291_v17 = vpop.f32.mrf.mxu0 }
 0x119   :  { %1150 = vpow2.f32 %v987_v15  ;;  %v990_v18 = vmul.f32 -1.442695, %v1474_v16  ;;  %v1478_v19 = vadd.f32 %v1463_v8, %v291_v17 }
 0x11a   :  { %v1083_v20 = vpop.f32.mrf.mxu0 }
 0x11b   :  { %1152 = vpow2.f32 %v990_v18  ;;  %v988_v21 = vmul.f32 -1.442695, %v1478_v19  ;;  %v1482_v22 = vadd.f32 %v1083_v20, %v1463_v8 }
 0x11c   :  { %v304_v23 = vpop.f32.mrf.mxu0 }
 0x11d   :  { %1154 = vpow2.f32 %v988_v21  ;;  %v993_v24 = vmul.f32 -1.442695, %v1482_v22  ;;  %v1486_v25 = vadd.f32 %v1463_v8, %v304_v23 }
 0x11e   :  { %v1084_v26 = vpop.f32.mrf.mxu0 }
 0x11f   :  { %1156 = vpow2.f32 %v993_v24  ;;  %v991_v27 = vmul.f32 -1.442695, %v1486_v25  ;;  %v1490_v28 = vadd.f32 %v1084_v26, %v1463_v8 }
 0x120   :  { %v307_v29 = vpop.f32.mrf.mxu0 }
 0x121   :  { %1158 = vpow2.f32 %v991_v27  ;;  %v994_v30 = vmul.f32 -1.442695, %v1490_v28  ;;  %v1494_v31 = vadd.f32 %v1463_v8, %v307_v29 }
 0x122   :  { %v1087_v32 = vpop.f32.mrf.mxu0 }
 0x123   :  { %1160 = vpow2.f32 %v994_v30  ;;  %v992_v33 = vmul.f32 -1.442695, %v1494_v31  ;;  %v1498_v34 = vadd.f32 %v1087_v32, %v1463_v8 }
 0x124   :  { %v1149_v35 = vpop.eup %1148  ;;  %v320_v36 = vpop.f32.mrf.mxu0 }
 0x125   :  { %v401_v37 = vadd.f32 1.0, %v1149_v35  ;;  %1162 = vpow2.f32 %v992_v33  ;;  %v997_v38 = vmul.f32 -1.442695, %v1498_v34  ;;  %v1502_v39 = vadd.f32 %v1463_v8, %v320_v36 }
 0x126   :  { %v1151_v40 = vpop.eup %1150  ;;  %v1088_v41 = vpop.f32.mrf.mxu0 }
 0x127   :  { %1164 = vrcp.f32 %v401_v37  ;;  %v399_v42 = vadd.f32 1.0, %v1151_v40  ;;  %v995_v43 = vmul.f32 -1.442695, %v1502_v39  ;;  %v1506_v44 = vadd.f32 %v1088_v41, %v1463_v8 }
 0x128   :  { %v1153_v45 = vpop.eup %1152  ;;  %1166 = vpow2.f32 %v997_v38  ;;  %v323_v46 = vpop.f32.mrf.mxu0 }
 0x129   :  { %1168 = vrcp.f32 %v399_v42  ;;  %v402_v47 = vadd.f32 1.0, %v1153_v45  ;;  %v998_v48 = vmul.f32 -1.442695, %v1506_v44  ;;  %v1510_v49 = vadd.f32 %v1463_v8, %v323_v46 }
 0x12a   :  { %v1155_v50 = vpop.eup %1154  ;;  %1170 = vpow2.f32 %v995_v43  ;;  %v1091_v51 = vpop.f32.mrf.mxu0 }
 0x12b   :  { %1172 = vrcp.f32 %v402_v47  ;;  %v400_v52 = vadd.f32 1.0, %v1155_v50  ;;  %v996_v53 = vmul.f32 -1.442695, %v1510_v49  ;;  %v1514_v54 = vadd.f32 %v1091_v51, %v1463_v8 }
 0x12c   :  { %v1157_v55 = vpop.eup %1156  ;;  %1174 = vpow2.f32 %v998_v48  ;;  %v336_v56 = vpop.f32.mrf.mxu0 }
 0x12d   :  { %1176 = vrcp.f32 %v400_v52  ;;  %v405_v57 = vadd.f32 1.0, %v1157_v55  ;;  %v1001_v58 = vmul.f32 -1.442695, %v1514_v54  ;;  %v1518_v59 = vadd.f32 %v1463_v8, %v336_v56 }
 0x12e   :  { %v1159_v60 = vpop.eup %1158  ;;  %1178 = vpow2.f32 %v996_v53  ;;  %v1092_v61 = vpop.f32.mrf.mxu0 }
 0x12f   :  { %1180 = vrcp.f32 %v405_v57  ;;  %v403_v62 = vadd.f32 1.0, %v1159_v60  ;;  %v999_v63 = vmul.f32 -1.442695, %v1518_v59  ;;  %v1522_v0 = vadd.f32 %v1092_v61, %v1463_v8 }
 0x130   :  { %v1161_v1 = vpop.eup %1160  ;;  %1182 = vpow2.f32 %v1001_v58  ;;  %v339_v2 = vpop.f32.mrf.mxu0 }
 0x131   :  { %1184 = vrcp.f32 %v403_v62  ;;  %v406_v3 = vadd.f32 1.0, %v1161_v1  ;;  %v1002_v4 = vmul.f32 -1.442695, %v1522_v0  ;;  %v1526_v5 = vadd.f32 %v1463_v8, %v339_v2 }
 0x132   :  { %v1163_v6 = vpop.eup %1162  ;;  %1186 = vpow2.f32 %v999_v63 }
 0x133   :  { %1188 = vrcp.f32 %v406_v3  ;;  %v404_v7 = vadd.f32 1.0, %v1163_v6  ;;  %v1000_v9 = vmul.f32 -1.442695, %v1526_v5 }
 0x134   :  { %v1165_v11 = vpop.eup %1164  ;;  %1190 = vpow2.f32 %v1002_v4 }
 0x135   :  { %v1167_v12 = vpop.eup %1166  ;;  %1192 = vrcp.f32 %v404_v7  ;;  %v449_v32 = vmul.f32 %v1165_v11, %v1466_v10 }
 0x136   :  { %v1169_v14 = vpop.eup %1168  ;;  %1194 = vpow2.f32 %v1000_v9  ;;  %v409_v21 = vadd.f32 1.0, %v1167_v12 }
 0x137   :  { %v1171_v15 = vpop.eup %1170  ;;  %v447_v27 = vmul.f32 %v1169_v14, %v1470_v13 }
 0x138   :  { %v1173_v17 = vpop.eup %1172  ;;  %v407_v18 = vadd.f32 1.0, %v1171_v15 }
 0x139   :  { %v1175_v20 = vpop.eup %1174  ;;  %v450_v8 = vmul.f32 %v1173_v17, %v1474_v16 }
 0x13a   :  { %v1177_v23 = vpop.eup %1176  ;;  %v410_v24 = vadd.f32 1.0, %v1175_v20  ;;  %1196 = vrcp.f32 %v407_v18 }
 0x13b   :  { %v1179_v26 = vpop.eup %1178  ;;  %v448_v29 = vmul.f32 %v1177_v23, %v1478_v19  ;;  %v464_v38 = vpack.c.bf16 %v450_v8, %v449_v32 }
 0x13c   :  { %v1181_v30 = vpop.eup %1180  ;;  %1198 = vrcp.f32 %v410_v24  ;;  %v408_v33 = vadd.f32 1.0, %v1179_v26 }
 0x13d   :  { %v1183_v35 = vpop.eup %1182  ;;  %1200 = vrcp.f32 %v409_v21  ;;  %v463_v36 = vpack.c.bf16 %v448_v29, %v447_v27  ;;  %v453_v48 = vmul.f32 %v1181_v30, %v1482_v22 }
 0x13e   :  { %v1185_v37 = vpop.eup %1184  ;;  %1202 = vrcp.f32 %v408_v33  ;;  %v413_v13 = vadd.f32 1.0, %v1183_v35 }
 0x13f   :  { %v1187_v40 = vpop.eup %1186  ;;  %1109 = vmatprep.mubr.bf16.mxu1 %v463_v36  ;;  %v451_v46 = vmul.f32 %v1185_v37, %v1486_v25 }
 0x140   :  { %v1189_v16 = vpop.eup %1188  ;;  %v411_v41 = vadd.f32 1.0, %v1187_v40  ;;  %1110 = vmatmul.mubr.bf16.vlgmr.msra.gmra.mxu1 %v464_v38 }
 0x141   :  { %v1191_v42 = vpop.eup %1190  ;;  %v454_v19 = vmul.f32 %v1189_v16, %v1490_v28 }
 0x142   :  { %v1193_v43 = vpop.eup %1192  ;;  %v414_v45 = vadd.f32 1.0, %v1191_v42  ;;  %1204 = vrcp.f32 %v411_v41 }
 0x143   :  { %v1195_v10 = vpop.eup %1194  ;;  %v452_v47 = vmul.f32 %v1193_v43, %v1494_v31  ;;  %v466_v52 = vpack.c.bf16 %v454_v19, %v453_v48 }
 0x144   :  { %1206 = vrcp.f32 %v414_v45  ;;  %v412_v50 = vadd.f32 1.0, %v1195_v10 }
 0x145   :  { %1208 = vrcp.f32 %v413_v13  ;;  %v465_v51 = vpack.c.bf16 %v452_v47, %v451_v46 }
 0x146   :  { %1210 = vrcp.f32 %v412_v50 }
 0x147   :  { %1113 = vmatprep.mubr.bf16.mxu1 %v465_v51  ;;  %v1197_v53 = vpop.eup %1196 }
 0x148   :  { %1114 = vmatmul.mubr.bf16.gmra.mxu1 %v466_v52  ;;  %v455_v25 = vmul.f32 %v1197_v53, %v1502_v39 }
 0x149   :  { %v1199_v55 = vpop.eup %1198 }
 0x14a   :  { %v1201_v28 = vpop.eup %1200  ;;  %v458_v57 = vmul.f32 %v1199_v55, %v1506_v44 }
 0x14b   :  { %v1203_v56 = vpop.eup %1202  ;;  %v457_v22 = vmul.f32 %v1201_v28, %v1498_v34  ;;  %v1548_v34 = vld [vmem:[%s1716_s5] ss:$0 sm:$0xff] }
 0x14c   :  { %v456_v31 = vmul.f32 %v1203_v56, %v1510_v49 }
 0x14d   :  { %v468_v60 = vpack.c.bf16 %v458_v57, %v457_v22 }
 0x14e   :  { %v467_v58 = vpack.c.bf16 %v456_v31, %v455_v25 }
 0x14f   :  { %v1205_v61 = vpop.eup %1204 }
 0x150   :  { %1117 = vmatprep.mubr.bf16.mxu1 %v467_v58  ;;  %v459_v3 = vmul.f32 %v1205_v61, %v1518_v59 }
 0x151   :  { %v1207_v62 = vpop.eup %1206  ;;  %1118 = vmatmul.mubr.bf16.gmra.mxu1 %v468_v60 }
 0x152   :  { %v1209_v63 = vpop.eup %1208  ;;  %v462_v2 = vmul.f32 %v1207_v62, %v1522_v0 }
 0x153   :  { %v1211_v1 = vpop.eup %1210  ;;  %v461_v39 = vmul.f32 %v1209_v63, %v1514_v54 }
 0x154   :  { %v460_v44 = vmul.f32 %v1211_v1, %v1526_v5 }
 0x155   :  { %v470_v49 = vpack.c.bf16 %v462_v2, %v461_v39 }
 0x156   :  { %v469_v4 = vpack.c.bf16 %v460_v44, %v459_v3 }
 0x158   :  { %1121 = vmatprep.mubr.bf16.mxu1 %v469_v4 }
 0x159   :  { %1122 = vmatmul.mubr.bf16.gmra.mxu1 %v470_v49 }
 0x200   :  { %v1111_v6 = vpop.f32.mrf.mxu1 }
 0x201   :  { %v1551_v7 = vadd.f32 %v1111_v6, %v1548_v34 }
 0x202   :  { %v576_v0 = vpop.f32.mrf.mxu1 }
 0x203   :  { %v1014_v59 = vmul.f32 -1.442695, %v1551_v7  ;;  %v1555_v5 = vadd.f32 %v1548_v34, %v576_v0 }
 0x204   :  { %v1112_v54 = vpop.f32.mrf.mxu1 }
 0x205   :  { %1212 = vpow2.f32 %v1014_v59  ;;  %v1012_v9 = vmul.f32 -1.442695, %v1555_v5  ;;  %v1559_v11 = vadd.f32 %v1112_v54, %v1548_v34  ;;  %v1617_v59 = vld [vmem:[%s1717_s6] ss:$0 sm:$0xff] }
 0x206   :  { %v579_v12 = vpop.f32.mrf.mxu1 }
 0x207   :  { %1214 = vpow2.f32 %v1012_v9  ;;  %v1015_v14 = vmul.f32 -1.442695, %v1559_v11  ;;  %v1563_v15 = vadd.f32 %v1548_v34, %v579_v12 }
 0x208   :  { %v1115_v17 = vpop.f32.mrf.mxu1 }
 0x209   :  { %1216 = vpow2.f32 %v1015_v14  ;;  %v1013_v18 = vmul.f32 -1.442695, %v1563_v15  ;;  %v1567_v20 = vadd.f32 %v1115_v17, %v1548_v34 }
 0x20a   :  { %v592_v21 = vpop.f32.mrf.mxu1 }
 0x20b   :  { %1218 = vpow2.f32 %v1013_v18  ;;  %v1018_v23 = vmul.f32 -1.442695, %v1567_v20  ;;  %v1571_v8 = vadd.f32 %v1548_v34, %v592_v21 }
 0x20c   :  { %v1116_v24 = vpop.f32.mrf.mxu1 }
 0x20d   :  { %1220 = vpow2.f32 %v1018_v23  ;;  %v1016_v26 = vmul.f32 -1.442695, %v1571_v8  ;;  %v1575_v27 = vadd.f32 %v1116_v24, %v1548_v34 }
 0x20e   :  { %v595_v29 = vpop.f32.mrf.mxu1 }
 0x20f   :  { %1222 = vpow2.f32 %v1016_v26  ;;  %v1019_v30 = vmul.f32 -1.442695, %v1575_v27  ;;  %v1579_v32 = vadd.f32 %v1548_v34, %v595_v29 }
 0x211   :  { %1224 = vpow2.f32 %v1019_v30  ;;  %v1017_v33 = vmul.f32 -1.442695, %v1579_v32  ;;  %v1119_v35 = vpop.f32.mrf.mxu1 }
 0x212   :  { %v1213_v36 = vpop.eup %1212  ;;  %v1583_v37 = vadd.f32 %v1119_v35, %v1548_v34 }
 0x213   :  { %v689_v38 = vadd.f32 1.0, %v1213_v36  ;;  %1226 = vpow2.f32 %v1017_v33  ;;  %v608_v40 = vpop.f32.mrf.mxu1 }
 0x214   :  { %v1215_v16 = vpop.eup %1214  ;;  %v1022_v41 = vmul.f32 -1.442695, %v1583_v37  ;;  %v1587_v42 = vadd.f32 %v1548_v34, %v608_v40 }
 0x215   :  { %1228 = vrcp.f32 %v689_v38  ;;  %v687_v13 = vadd.f32 1.0, %v1215_v16  ;;  %v1120_v43 = vpop.f32.mrf.mxu1 }
 0x216   :  { %v1217_v19 = vpop.eup %1216  ;;  %1230 = vpow2.f32 %v1022_v41  ;;  %v1020_v45 = vmul.f32 -1.442695, %v1587_v42  ;;  %v1591_v10 = vadd.f32 %v1120_v43, %v1548_v34 }
 0x217   :  { %1232 = vrcp.f32 %v687_v13  ;;  %v690_v46 = vadd.f32 1.0, %v1217_v19  ;;  %v611_v47 = vpop.f32.mrf.mxu1 }
 0x218   :  { %v1219_v48 = vpop.eup %1218  ;;  %1234 = vpow2.f32 %v1020_v45  ;;  %v1023_v50 = vmul.f32 -1.442695, %v1591_v10  ;;  %v1595_v51 = vadd.f32 %v1548_v34, %v611_v47 }
 0x219   :  { %1236 = vrcp.f32 %v690_v46  ;;  %v688_v52 = vadd.f32 1.0, %v1219_v48  ;;  %v1123_v53 = vpop.f32.mrf.mxu1 }
 0x21a   :  { %v1221_v55 = vpop.eup %1220  ;;  %1238 = vpow2.f32 %v1023_v50  ;;  %v1021_v28 = vmul.f32 -1.442695, %v1595_v51  ;;  %v1599_v56 = vadd.f32 %v1123_v53, %v1548_v34 }
 0x21b   :  { %1240 = vrcp.f32 %v688_v52  ;;  %v693_v57 = vadd.f32 1.0, %v1221_v55  ;;  %v624_v25 = vpop.f32.mrf.mxu1 }
 0x21c   :  { %v1223_v31 = vpop.eup %1222  ;;  %1242 = vpow2.f32 %v1021_v28  ;;  %v1026_v22 = vmul.f32 -1.442695, %v1599_v56  ;;  %v1603_v58 = vadd.f32 %v1548_v34, %v624_v25 }
 0x21d   :  { %1244 = vrcp.f32 %v693_v57  ;;  %v691_v60 = vadd.f32 1.0, %v1223_v31  ;;  %v1124_v61 = vpop.f32.mrf.mxu1 }
 0x21e   :  { %v1225_v62 = vpop.eup %1224  ;;  %1246 = vpow2.f32 %v1026_v22  ;;  %v1024_v63 = vmul.f32 -1.442695, %v1603_v58  ;;  %v1607_v1 = vadd.f32 %v1124_v61, %v1548_v34 }
 0x21f   :  { %1248 = vrcp.f32 %v691_v60  ;;  %v694_v2 = vadd.f32 1.0, %v1225_v62  ;;  %v627_v3 = vpop.f32.mrf.mxu1 }
 0x220   :  { %v1227_v44 = vpop.eup %1226  ;;  %1250 = vpow2.f32 %v1024_v63  ;;  %v1027_v39 = vmul.f32 -1.442695, %v1607_v1  ;;  %v1611_v4 = vadd.f32 %v1548_v34, %v627_v3 }
 0x221   :  { %1252 = vrcp.f32 %v694_v2  ;;  %v692_v49 = vadd.f32 1.0, %v1227_v44 }
 0x222   :  { %v1229_v6 = vpop.eup %1228  ;;  %1254 = vpow2.f32 %v1027_v39  ;;  %v1025_v0 = vmul.f32 -1.442695, %v1611_v4 }
 0x223   :  { %v1231_v54 = vpop.eup %1230  ;;  %1256 = vrcp.f32 %v692_v49  ;;  %v737_v9 = vmul.f32 %v1229_v6, %v1551_v7 }
 0x224   :  { %v1233_v12 = vpop.eup %1232  ;;  %v697_v14 = vadd.f32 1.0, %v1231_v54  ;;  %1258 = vpow2.f32 %v1025_v0 }
 0x225   :  { %v1235_v34 = vpop.eup %1234  ;;  %v760_v17 = vmul.f32 %v1617_v59, %v737_v9  ;;  %v735_v18 = vmul.f32 %v1233_v12, %v1555_v5 }
 0x226   :  { %v1237_v21 = vpop.eup %1236  ;;  %1260 = vrcp.f32 %v697_v14  ;;  %v695_v23 = vadd.f32 1.0, %v1235_v34  ;;  %v840_v14 = vlaneseq }
 0x227   :  { %v1239_v24 = vpop.eup %1238  ;;  %v738_v26 = vmul.f32 %v1237_v21, %v1559_v11  ;;  %778 = vadd.xlane.f32.xlu1 %v760_v17  ;;  %v758_v29 = vmul.f32 %v1617_v59, %v735_v18  ;;  %v1660_v21 = vstv %s1718_s7  ;;  %s1390_s7 = smov [#allocation11]  }
 0x228   :  { %v1241_v30 = vpop.eup %1240  ;;  %1262 = vrcp.f32 %v695_v23  ;;  %v698_v7 = vadd.f32 1.0, %v1239_v24  ;;  %s959_s28 = sshll.u32 %s1390_s7, 4  ;;  %s960_s28 = int_to_ptr.vmem [resolvable:$true] %s959_s28 }
 0x229   :  { %v1243_v33 = vpop.eup %1242  ;;  %v736_v35 = vmul.f32 %v1241_v30, %v1563_v15  ;;  %774 = vadd.xlane.f32.xlu0 %v758_v29  ;;  %v761_v36 = vmul.f32 %v1617_v59, %v738_v26  ;;  %s1356_s29 = scalar_lea.vmem %s960_s28, 16  ;;  %s1360_s30 = scalar_lea.vmem %s960_s28, 32 }
 0x22a   :  { %v1245_v38 = vpop.eup %1244  ;;  %1264 = vrcp.f32 %v698_v7  ;;  %v696_v5 = vadd.f32 1.0, %v1243_v33  ;;  %p1357_p6 = scmp.ne.s32.totalorder %s960_s28, %s1356_s29  ;;  %p1361_p7 = scmp.lt.s32.totalorder %s960_s28, %s960_s28 }
 0x22b   :  { %v1247_v40 = vpop.eup %1246  ;;  %v741_v16 = vmul.f32 %v1245_v38, %v1567_v20  ;;  %780 = vadd.xlane.f32.xlu1 %v761_v36  ;;  %v759_v11 = vmul.f32 %v1617_v59, %v736_v35  ;;  %p1362_p8 = scmp.lt.s32.totalorder %s1360_s30, %s1356_s29 }
 0x22c   :  { %v1249_v41 = vpop.eup %1248  ;;  %1266 = vrcp.f32 %v696_v5  ;;  %v701_v13 = vadd.f32 1.0, %v1247_v40 }
 0x22d   :  { %v1251_v43 = vpop.eup %1250  ;;  %776 = vadd.xlane.f32.xlu0 %v759_v11  ;;  %v739_v46 = vmul.f32 %v1249_v41, %v1571_v8  ;;  %v764_v48 = vmul.f32 %v1617_v59, %v741_v16  ;;  %p1363_p9 = por %p1362_p8, %p1361_p7 }
 0x22e   :  { %v1253_v19 = vpop.eup %1252  ;;  %v699_v45 = vadd.f32 1.0, %v1251_v43  ;;  %1268 = vrcp.f32 %v701_v13 }
 0x22f   :  { %v1255_v15 = vpop.eup %1254  ;;  %v742_v47 = vmul.f32 %v1253_v19, %v1575_v27  ;;  %v762_v8 = vmul.f32 %v1617_v59, %v739_v46  ;;  %p1364_p10 = pnand %p1363_p9, %p1357_p6 }
 0x230   :  { %v1257_v50 = vpop.eup %1256  ;;  %1270 = vrcp.f32 %v699_v45  ;;  %v702_v20 = vadd.f32 1.0, %v1255_v15 }
 0x231   :  { %v1259_v52 = vpop.eup %1258  ;;  %v740_v53 = vmul.f32 %v1257_v50, %v1579_v32  ;;  %786 = vadd.xlane.f32.xlu0 %v764_v48  ;;  %v765_v55 = vmul.f32 %v1617_v59, %v742_v47 }
 0x232   :  { %v700_v28 = vadd.f32 1.0, %v1259_v52  ;;  %1272 = vrcp.f32 %v702_v20 }
 0x233   :  { %v1261_v57 = vpop.eup %1260  ;;  %788 = vadd.xlane.f32.xlu1 %v765_v55  ;;  %v763_v31 = vmul.f32 %v1617_v59, %v740_v53 }
 0x234   :  { %v745_v27 = vmul.f32 %v1261_v57, %v1583_v37  ;;  %1274 = vrcp.f32 %v700_v28 }
 0x235   :  { %v1263_v25 = vpop.eup %1262  ;;  %782 = vadd.xlane.f32.xlu0 %v762_v8 }
 0x236   :  { %v743_v60 = vmul.f32 %v1263_v25, %v1587_v42  ;;  %v768_v32 = vmul.f32 %v1617_v59, %v745_v27 }
 0x237   :  { %v1265_v22 = vpop.eup %1264  ;;  %784 = vadd.xlane.f32.xlu1 %v763_v31 }
 0x238   :  { %v746_v61 = vmul.f32 %v1265_v22, %v1591_v10  ;;  %v766_v37 = vmul.f32 %v1617_v59, %v743_v60 }
 0x239   :  { %v1267_v62 = vpop.eup %1266  ;;  %794 = vadd.xlane.f32.xlu0 %v768_v32 }
 0x23a   :  { %v744_v63 = vmul.f32 %v1267_v62, %v1595_v51  ;;  %v769_v2 = vmul.f32 %v1617_v59, %v746_v61 }
 0x23b   :  { %v1269_v3 = vpop.eup %1268 }
 0x23c   :  { %796 = vadd.xlane.f32.xlu1 %v769_v2  ;;  %v767_v42 = vmul.f32 %v1617_v59, %v744_v63  ;;  %v749_v6 = vmul.f32 %v1269_v3, %v1599_v56  ;;  %v1651_v56 = vand.u32 127, %v840_v14 }
 0x23d   :  { %v1271_v44 = vpop.eup %1270  ;;  %790 = vadd.xlane.f32.xlu0 %v766_v37 }
 0x23e   :  { %v747_v39 = vmul.f32 %v1271_v44, %v1603_v58  ;;  %v772_v12 = vmul.f32 %v1617_v59, %v749_v6  ;;  %v846_v34 = vadd.s32 4294967288, %v1651_v56  ;;  %v860_v29 = vadd.s32 4294967272, %v1651_v56 }
 0x23f   :  { %v1273_v49 = vpop.eup %1272  ;;  %v867_v38 = vadd.s32 4294967264, %v1651_v56  ;;  %v874_v11 = vadd.s32 4294967256, %v1651_v56  ;;  %v881_v43 = vadd.s32 4294967248, %v1651_v56  ;;  %v888_v46 = vadd.s32 4294967240, %v1651_v56 }
 0x240   :  { %792 = vadd.xlane.f32.xlu1 %v767_v42  ;;  %v770_v10 = vmul.f32 %v1617_v59, %v747_v39  ;;  %v750_v54 = vmul.f32 %v1273_v49, %v1607_v1  ;;  %v853_v1 = vadd.s32 4294967280, %v1651_v56  ;;  %v895_v27 = vadd.s32 4294967232, %v1651_v56 }
 0x241   :  { %v1275_v0 = vpop.eup %1274  ;;  %v909_v62 = vadd.s32 4294967216, %v1651_v56  ;;  %v902_v63 = vadd.s32 4294967224, %v1651_v56  ;;  %v916_v3 = vadd.s32 4294967208, %v1651_v56 }
 0x242   :  { %v748_v51 = vmul.f32 %v1275_v0, %v1611_v4  ;;  %798 = vadd.xlane.f32.xlu0 %v770_v10  ;;  %v773_v58 = vmul.f32 %v1617_v59, %v750_v54  ;;  %v1654_v4 = vshrl.u32 %v840_v14, 7  ;;  %v923_v10 = vadd.s32 4294967200, %v1651_v56 }
 0x244   :  { %v771_v9 = vmul.f32 %v1617_v59, %v748_v51  ;;  %v849_v23 = vsub.s32 %v846_v34, %v1654_v4  ;;  %v844_v59 = vsub.s32 %v1651_v56, %v1654_v4  ;;  %v856_v7 = vsub.s32 %v853_v1, %v1654_v4 }
 0x245   :  { %v863_v16 = vsub.s32 %v860_v29, %v1654_v4  ;;  %v870_v15 = vsub.s32 %v867_v38, %v1654_v4  ;;  %v877_v20 = vsub.s32 %v874_v11, %v1654_v4  ;;  %v884_v53 = vsub.s32 %v881_v43, %v1654_v4 }
 0x246   :  { %800 = vadd.xlane.f32.xlu1 %v771_v9  ;;  %802 = vadd.xlane.f32.xlu0 %v772_v12  ;;  %v891_v22 = vsub.s32 %v888_v46, %v1654_v4  ;;  %v898_v39 = vsub.s32 %v895_v27, %v1654_v4  ;;  %v905_v51 = vsub.s32 %v902_v63, %v1654_v4  ;;  %v930_v1 = vadd.s32 4294967192, %v1651_v56 }
 0x247   :  { %v912_v54 = vsub.s32 %v909_v62, %v1654_v4  ;;  %v919_v12 = vsub.s32 %v916_v3, %v1654_v4  ;;  %v944_v38 = vadd.s32 4294967176, %v1651_v56 }
 0x24a   :  { %804 = vadd.xlane.f32.xlu1 %v773_v58 }
 0x2b0   :  { %v779_v17 = vpop.xlane.xlu1 %778 }
 0x2b1   :  { %v810_v35 = vadd.f32 %v1660_v21, %v779_v17 }
 0x2b2   :  { %v775_v18 = vpop.xlane.xlu0 %774 }
 0x2b3   :  { %v808_v24 = vadd.f32 %v1660_v21, %v775_v18  ;;  %v857_v45 = vrot.slane %v810_v35, %v856_v7 }
 0x2b4   :  { %v781_v33 = vpop.xlane.xlu1 %780 }
 0x2b5   :  { %v845_v5 = vrot.slane %v808_v24, %v844_v59  ;;  %v811_v41 = vadd.f32 %v1660_v21, %v781_v33  ;;  %v926_v59 = vsub.s32 %v923_v10, %v1654_v4 }
 0x2b6   :  { %v777_v26 = vpop.xlane.xlu0 %776 }
 0x2b7   :  { %v809_v30 = vadd.f32 %v1660_v21, %v777_v26  ;;  %v864_v52 = vrot.slane %v811_v41, %v863_v16  ;;  %v937_v26 = vadd.s32 4294967184, %v1651_v56 }
 0x2b9   :  { %v850_v36 = vrot.slane %v809_v30, %v849_v23  ;;  %v940_v11 = vsub.s32 %v937_v26, %v1654_v4 }
 0x2ba   :  { %v787_v40 = vpop.xlane.xlu0 %786 }
 0x2bb   :  { %v852_v13 = vsel %vm851_vm0, %v850_v36, %v845_v5  ;;  %v814_v28 = vadd.f32 %v1660_v21, %v787_v40  ;;  %v933_v36 = vsub.s32 %v930_v1, %v1654_v4 }
 0x2bc   :  { %v789_v19 = vpop.xlane.xlu1 %788  ;;  %v859_v48 = vsel %vm858_vm1, %v857_v45, %v852_v13 }
 0x2bd   :  { %v866_v25 = vsel %vm865_vm2, %v864_v52, %v859_v48  ;;  %v815_v61 = vadd.f32 %v1660_v21, %v789_v19  ;;  %v885_v2 = vrot.slane %v814_v28, %v884_v53 }
 0x2be   :  { %v783_v47 = vpop.xlane.xlu0 %782 }
 0x2bf   :  { %v812_v50 = vadd.f32 %v1660_v21, %v783_v47  ;;  %v892_v0 = vrot.slane %v815_v61, %v891_v22 }
 0x2c0   :  { %v785_v55 = vpop.xlane.xlu1 %784 }
 0x2c1   :  { %v871_v57 = vrot.slane %v812_v50, %v870_v15  ;;  %v813_v8 = vadd.f32 %v1660_v21, %v785_v55  ;;  %v947_v15 = vsub.s32 %v944_v38, %v1654_v4 }
 0x2c2   :  { %v795_v31 = vpop.xlane.xlu0 %794 }
 0x2c3   :  { %v873_v60 = vsel %vm872_vm3, %v871_v57, %v866_v25  ;;  %v878_v32 = vrot.slane %v813_v8, %v877_v20  ;;  %v818_v9 = vadd.f32 %v1660_v21, %v795_v31 }
 0x2c5   :  { %v880_v37 = vsel %vm879_vm4, %v878_v32, %v873_v60  ;;  %v797_v44 = vpop.xlane.xlu1 %796  ;;  %v913_v7 = vrot.slane %v818_v9, %v912_v54 }
 0x2c6   :  { %v791_v42 = vpop.xlane.xlu0 %790  ;;  %v887_v49 = vsel %vm886_vm5, %v885_v2, %v880_v37  ;;  %v819_v34 = vadd.f32 %v1660_v21, %v797_v44 }
 0x2c7   :  { %v816_v6 = vadd.f32 %v1660_v21, %v791_v42  ;;  %v894_v17 = vsel %vm893_vm6, %v892_v0, %v887_v49 }
 0x2c8   :  { %v920_v33 = vrot.slane %v819_v34, %v919_v12 }
 0x2c9   :  { %v899_v58 = vrot.slane %v816_v6, %v898_v39  ;;  %v793_v14 = vpop.xlane.xlu1 %792 }
 0x2ca   :  { %v817_v18 = vadd.f32 %v1660_v21, %v793_v14 }
 0x2cb   :  { %v901_v23 = vsel %vm900_vm7, %v899_v58, %v894_v17  ;;  %v799_v24 = vpop.xlane.xlu0 %798 }
 0x2cc   :  { %v906_v29 = vrot.slane %v817_v18, %v905_v51  ;;  %v820_v30 = vadd.f32 %v1660_v21, %v799_v24 }
 0x2ce   :  { %v908_v35 = vsel %vm907_vm8, %v906_v29, %v901_v23  ;;  %v927_v40 = vrot.slane %v820_v30, %v926_v59 }
 0x2cf   :  { %v915_v5 = vsel %vm914_vm9, %v913_v7, %v908_v35  ;;  %v801_v16 = vpop.xlane.xlu1 %800  ;;  %v803_v41 = vpop.xlane.xlu0 %802 }
 0x2d0   :  { %v922_v13 = vsel %vm921_vm10, %v920_v33, %v915_v5  ;;  %v821_v43 = vadd.f32 %v1660_v21, %v801_v16  ;;  %v822_v19 = vadd.f32 %v1660_v21, %v803_v41 }
 0x2d1   :  { %v929_v46 = vsel %vm928_vm11, %v927_v40, %v922_v13 }
 0x2d2   :  { %v934_v45 = vrot.slane %v821_v43, %v933_v36  ;;  %v941_v47 = vrot.slane %v822_v19, %v940_v11 }
 0x2d3   :  { %v805_v48 = vpop.xlane.xlu1 %804 }
 0x2d4   :  { %v936_v56 = vsel %vm935_vm12, %v934_v45, %v929_v46  ;;  %v823_v50 = vadd.f32 %v1660_v21, %v805_v48 }
 0x2d5   :  { %v943_v52 = vsel %vm942_vm13, %v941_v47, %v936_v56 }
 0x2d6   :  { %v948_v20 = vrot.slane %v823_v50, %v947_v15 }
 0x2d8   :  { %v950_v53 = vsel %vm949_vm14, %v948_v20, %v943_v52 }
 0x2d9   :  { %952 = vst [vmem:[#allocation11] sm:$0x1] %v950_v53 }
 0x2da   :  { %1367 = shalt.err (!%p1364_p10)
}
 0x2db   :  { %962 = dma.vmem_to_hbm [thread:$0]  %s960_s28, 16, %s1719_s8, [#allocation5]  }
 0x2dc   :  { %1382 = dma.done.wait [#allocation5], 16  }
 0x2dd   :  { %1383 = vsyncadd [#allocation5], 4294967280 }
 0x2de   :  { %966 = vsyncpa [#allocation4], 1 }
 0x2df   :  { %967 = vsyncpa [#allocation7], 1 }
 0x2e0   :  { %968 = vsyncpa [#allocation10], 1 }
 0x2e1   :  { %969 = vsyncpa [#allocation5], 1 }

</bundles_post_ra>
